<compile_context>
chip_gen: v5e
topology: v5e:2x2
jax: 0.10.0
libtpu: 0.0.40
codegen_flags: <defaults>
</compile_context>

<pallas_src>
import jax
import jax.numpy as jnp
from jax.experimental import pallas as pl
from jax.experimental.pallas import tpu as pltpu


def rawnet_kernel(x_ref, w1_ref, w2_ref, w3_ref, b1_ref, b2_ref, b3_ref, o_ref):
    x = x_ref[...]                      # (2, TB)   batch on lanes
    w1 = w1_ref[...]                    # (H, 2)

    # Layer 1 (in=2): a K=2 matmul would waste the MXU, so do it as two
    # broadcast FMAs on the VPU.  (H,1)*(1,TB) broadcasts -> (H, TB), lane-dense.
    h1 = jnp.tanh(w1[:, 0:1] * x[0:1, :] + w1[:, 1:2] * x[1:2, :] + b1_ref[...])

    # Layer 2 (H -> 2H): the only matmul worth the MXU.  (2H,H)@(H,TB) = (2H,TB).
    h2 = jnp.tanh(
        jnp.dot(w2_ref[...], h1, preferred_element_type=jnp.float32) + b2_ref[...]
    )

    # Layer 3 (2H -> 1): run on the otherwise-idle MXU, (1,2H)@(2H,TB) = (1,TB),
    # instead of a VPU-mul + cross-sublane XLU reduction.
    z = jnp.dot(w3_ref[...], h2, preferred_element_type=jnp.float32) + b3_ref[...]

    # sigmoid(z) == 0.5*(tanh(0.5*z)+1): single EUP op per vreg.  (1, TB) is
    # already lane-dense -> unmasked vst, zero relayout.
    o_ref[...] = 0.5 * (jnp.tanh(0.5 * z) + 1.0)


def prepare_params(params):
    """One-time kernel-layout prep (hoisted out of the per-call path).

    With batch-on-lanes, the PyTorch (out_features, in_features) weight layout is
    already what the kernel wants — no transposes.  Biases become (F, 1) columns
    that broadcast along lanes.
    """
    H = params["w1"].shape[0]
    f32 = lambda a: jnp.asarray(a, jnp.float32)
    w1 = f32(params["w1"])                       # (H, 2)
    w2 = f32(params["w2"])                       # (2H, H)
    w3 = f32(params["w3"]).reshape(1, 2 * H)     # (1, 2H)
    b1 = f32(params["b1"]).reshape(H, 1)         # (H, 1)
    b2 = f32(params["b2"]).reshape(2 * H, 1)     # (2H, 1)
    b3 = f32(params["b3"]).reshape(1, 1)         # (1, 1)
    return w1, w2, w3, b1, b2, b3


def rawnet_forward(x, prepped, *, block_b=256):
    """x: (B, 2) float32.  prepped: output of prepare_params().  Returns (B, 1).

    block_b: batch tile (multiple of 128).  256 keeps the per-block live set
    register-resident (no spills) and gives >= 2 grid steps for modest batches so
    v7x can shard the batch across its two TensorCores.  VMEM capacity is not the
    limiter on any generation at these sizes.
    """
    w1, w2, w3, b1, b2, b3 = prepped
    B = x.shape[0]
    assert block_b % 128 == 0

    # Batch on lanes: a (2, block_b) tile is lane-dense (two contiguous DMA runs)
    # vs. the old (block_b, 2) tile that used 2/128 lanes.
    x_t = x.T                                          # (2, B)

    num_blocks = pl.cdiv(B, block_b)                   # ragged tail handled by Pallas masking
    resident = lambda i: (0, 0)                        # weights/biases stay VMEM-resident

    out = pl.pallas_call(
        rawnet_kernel,
        out_shape=jax.ShapeDtypeStruct((1, B), jnp.float32),
        grid=(num_blocks,),
        in_specs=[
            pl.BlockSpec((2, block_b), lambda i: (0, i)),   # x^T: batch-tiled on lanes
            pl.BlockSpec(w1.shape, resident),
            pl.BlockSpec(w2.shape, resident),
            pl.BlockSpec(w3.shape, resident),
            pl.BlockSpec(b1.shape, resident),
            pl.BlockSpec(b2.shape, resident),
            pl.BlockSpec(b3.shape, resident),
        ],
        out_specs=pl.BlockSpec((1, block_b), lambda i: (0, i)),  # lane-dense stores
        compiler_params=pltpu.CompilerParams(
            dimension_semantics=("parallel",),  # lets v7x shard the batch over its 2 TCs
        ),
    )(x_t, w1, w2, w3, b1, b2, b3)

    return out.reshape(B, 1)  # match the nn.Module's (B, 1) output


def init_params(key, num_hid):
    """Deterministic init mimicking nn.Linear default (uniform +-1/sqrt(fan_in))."""
    def linear_init(key, fan_in, fan_out):
        kw, kb = jax.random.split(key)
        bound = 1.0 / jnp.sqrt(float(fan_in))
        w = jax.random.uniform(kw, (fan_out, fan_in), jnp.float32, -bound, bound)
        b = jax.random.uniform(kb, (fan_out,), jnp.float32, -bound, bound)
        return w, b

    k1, k2, k3 = jax.random.split(key, 3)
    w1, b1 = linear_init(k1, 2, num_hid)
    w2, b2 = linear_init(k2, num_hid, num_hid * 2)
    w3, b3 = linear_init(k3, num_hid * 2, 1)
    return {"w1": w1, "b1": b1, "w2": w2, "b2": b2, "w3": w3, "b3": b3}


def rawnet_reference(x, p):
    h1 = jnp.tanh(x @ p["w1"].T + p["b1"])
    h2 = jnp.tanh(h1 @ p["w2"].T + p["b2"])
    return jax.nn.sigmoid(h2 @ p["w3"].T + p["b3"])


if __name__ == "__main__":
    key = jax.random.PRNGKey(0)
    k_x, k_p = jax.random.split(key)

    batch = 1000       # not a multiple of block_b -> exercises the masked ragged tail
    num_hid = 32
    x = jax.random.normal(k_x, (batch, 2), dtype=jnp.float32)
    params = init_params(k_p, num_hid)

    prepped = prepare_params(params)  # one-time layout prep, outside the per-call path
    fwd = jax.jit(rawnet_forward, static_argnames=("block_b",))

    out = jax.block_until_ready(fwd(x, prepped, block_b=256))  # grid = (4,)

    ref = rawnet_reference(x, params)
    assert out.shape == (batch, 1)
    max_err = float(jnp.max(jnp.abs(out - ref)))
    assert jnp.allclose(out, ref, atol=5e-5, rtol=5e-5), max_err
    print("KERNEL_OK")
</pallas_src>

<mosaic_0001>
module attributes {stable_mosaic.version = 11 : i64} {
  func.func @rawnet_kernel(%arg0: i32, %arg1: memref<2x256xf32, #tpu.memory_space<vmem>>, %arg2: memref<32x2xf32, #tpu.memory_space<vmem>>, %arg3: memref<64x32xf32, #tpu.memory_space<vmem>>, %arg4: memref<1x64xf32, #tpu.memory_space<vmem>>, %arg5: memref<32x1xf32, #tpu.memory_space<vmem>>, %arg6: memref<64x1xf32, #tpu.memory_space<vmem>>, %arg7: memref<1x1xf32, #tpu.memory_space<vmem>>, %arg8: memref<1x256xf32, #tpu.memory_space<vmem>>) attributes {dimension_semantics = [#tpu.dimension_semantics<parallel>], iteration_bounds = array<i64: 4>, scalar_prefetch = 0 : i64, scratch_operands = 0 : i64, tpu.core_type = #tpu.core_type<tc>, window_params = [{transform_indices = @transform_0, window_bounds = array<i64: 2, 256>}, {pipeline_mode = #tpu.pipeline_mode<synchronous>, transform_indices = @transform_1, window_bounds = array<i64: 32, 2>}, {pipeline_mode = #tpu.pipeline_mode<synchronous>, transform_indices = @transform_2, window_bounds = array<i64: 64, 32>}, {pipeline_mode = #tpu.pipeline_mode<synchronous>, transform_indices = @transform_3, window_bounds = array<i64: 1, 64>}, {pipeline_mode = #tpu.pipeline_mode<synchronous>, transform_indices = @transform_4, window_bounds = array<i64: 32, 1>}, {pipeline_mode = #tpu.pipeline_mode<synchronous>, transform_indices = @transform_5, window_bounds = array<i64: 64, 1>}, {pipeline_mode = #tpu.pipeline_mode<synchronous>, transform_indices = @transform_6, window_bounds = array<i64: 1, 1>}, {transform_indices = @transform_7, window_bounds = array<i64: 1, 256>}]} {
    %c0 = arith.constant 0 : index
    %c0_0 = arith.constant 0 : index
    %0 = vector.load %arg1[%c0, %c0_0] : memref<2x256xf32, #tpu.memory_space<vmem>>, vector<2x256xf32>
    %c0_1 = arith.constant 0 : index
    %c0_2 = arith.constant 0 : index
    %1 = vector.load %arg2[%c0_1, %c0_2] : memref<32x2xf32, #tpu.memory_space<vmem>>, vector<32x2xf32>
    %2 = vector.extract_strided_slice %1 {offsets = [0, 0], sizes = [32, 1], strides = [1, 1]} : vector<32x2xf32> to vector<32x1xf32>
    %3 = vector.extract_strided_slice %0 {offsets = [0, 0], sizes = [1, 256], strides = [1, 1]} : vector<2x256xf32> to vector<1x256xf32>
    %4 = vector.broadcast %2 : vector<32x1xf32> to vector<32x256xf32>
    %5 = vector.broadcast %3 : vector<1x256xf32> to vector<32x256xf32>
    %6 = arith.mulf %4, %5 : vector<32x256xf32>
    %7 = vector.extract_strided_slice %1 {offsets = [0, 1], sizes = [32, 1], strides = [1, 1]} : vector<32x2xf32> to vector<32x1xf32>
    %8 = vector.extract_strided_slice %0 {offsets = [1, 0], sizes = [1, 256], strides = [1, 1]} : vector<2x256xf32> to vector<1x256xf32>
    %9 = vector.broadcast %7 : vector<32x1xf32> to vector<32x256xf32>
    %10 = vector.broadcast %8 : vector<1x256xf32> to vector<32x256xf32>
    %11 = arith.mulf %9, %10 : vector<32x256xf32>
    %12 = arith.addf %6, %11 : vector<32x256xf32>
    %c0_3 = arith.constant 0 : index
    %c0_4 = arith.constant 0 : index
    %13 = vector.load %arg5[%c0_3, %c0_4] : memref<32x1xf32, #tpu.memory_space<vmem>>, vector<32x1xf32>
    %14 = vector.broadcast %13 : vector<32x1xf32> to vector<32x256xf32>
    %15 = arith.addf %12, %14 : vector<32x256xf32>
    %16 = math.tanh %15 : vector<32x256xf32>
    %c0_5 = arith.constant 0 : index
    %c0_6 = arith.constant 0 : index
    %17 = vector.load %arg3[%c0_5, %c0_6] : memref<64x32xf32, #tpu.memory_space<vmem>>, vector<64x32xf32>
    %cst = arith.constant dense<0.000000e+00> : vector<64x256xf32>
    %18 = tpu.matmul %17, %16, %cst {dimension_numbers = #tpu.dot_dimension_numbers<[1], [0], [0], [1], [0, 0, 1, 1], [], []>} : vector<64x32xf32>, vector<32x256xf32>, vector<64x256xf32> -> vector<64x256xf32>
    %c0_7 = arith.constant 0 : index
    %c0_8 = arith.constant 0 : index
    %19 = vector.load %arg6[%c0_7, %c0_8] : memref<64x1xf32, #tpu.memory_space<vmem>>, vector<64x1xf32>
    %20 = vector.broadcast %19 : vector<64x1xf32> to vector<64x256xf32>
    %21 = arith.addf %18, %20 : vector<64x256xf32>
    %22 = math.tanh %21 : vector<64x256xf32>
    %c0_9 = arith.constant 0 : index
    %c0_10 = arith.constant 0 : index
    %23 = vector.load %arg4[%c0_9, %c0_10] : memref<1x64xf32, #tpu.memory_space<vmem>>, vector<1x64xf32>
    %cst_11 = arith.constant dense<0.000000e+00> : vector<1x256xf32>
    %24 = tpu.matmul %23, %22, %cst_11 {dimension_numbers = #tpu.dot_dimension_numbers<[1], [0], [0], [1], [0, 0, 1, 1], [], []>} : vector<1x64xf32>, vector<64x256xf32>, vector<1x256xf32> -> vector<1x256xf32>
    %c0_12 = arith.constant 0 : index
    %c0_13 = arith.constant 0 : index
    %25 = vector.load %arg7[%c0_12, %c0_13] : memref<1x1xf32, #tpu.memory_space<vmem>>, vector<1x1xf32>
    %26 = vector.broadcast %25 : vector<1x1xf32> to vector<1x256xf32>
    %27 = arith.addf %24, %26 : vector<1x256xf32>
    %cst_14 = arith.constant 5.000000e-01 : f32
    %28 = vector.broadcast %cst_14 : f32 to vector<1x256xf32>
    %29 = arith.mulf %28, %27 : vector<1x256xf32>
    %30 = math.tanh %29 : vector<1x256xf32>
    %cst_15 = arith.constant 1.000000e+00 : f32
    %31 = vector.broadcast %cst_15 : f32 to vector<1x256xf32>
    %32 = arith.addf %30, %31 : vector<1x256xf32>
    %cst_16 = arith.constant 5.000000e-01 : f32
    %33 = vector.broadcast %cst_16 : f32 to vector<1x256xf32>
    %34 = arith.mulf %33, %32 : vector<1x256xf32>
    %c0_17 = arith.constant 0 : index
    %c0_18 = arith.constant 0 : index
    %35 = vector.load %arg8[%c0_17, %c0_18] : memref<1x256xf32, #tpu.memory_space<vmem>>, vector<1x256xf32>
    tpu.vector_store %arg8[%c0_17, %c0_18], %34 {strides = array<i32>} : memref<1x256xf32, #tpu.memory_space<vmem>>, vector<1x256xf32>,
    return
  }
  func.func @transform_0(%arg0: i32) -> (i32, i32) {
    %c0_i32 = arith.constant 0 : i32
    %c0_i32_0 = arith.constant 0 : i32
    return %c0_i32, %arg0 : i32, i32
  }
  func.func @transform_1(%arg0: i32) -> (i32, i32) {
    %c0_i32 = arith.constant 0 : i32
    %c0_i32_0 = arith.constant 0 : i32
    %c0_i32_1 = arith.constant 0 : i32
    return %c0_i32, %c0_i32_0 : i32, i32
  }
  func.func @transform_2(%arg0: i32) -> (i32, i32) {
    %c0_i32 = arith.constant 0 : i32
    %c0_i32_0 = arith.constant 0 : i32
    %c0_i32_1 = arith.constant 0 : i32
    return %c0_i32, %c0_i32_0 : i32, i32
  }
  func.func @transform_3(%arg0: i32) -> (i32, i32) {
    %c0_i32 = arith.constant 0 : i32
    %c0_i32_0 = arith.constant 0 : i32
    %c0_i32_1 = arith.constant 0 : i32
    return %c0_i32, %c0_i32_0 : i32, i32
  }
  func.func @transform_4(%arg0: i32) -> (i32, i32) {
    %c0_i32 = arith.constant 0 : i32
    %c0_i32_0 = arith.constant 0 : i32
    %c0_i32_1 = arith.constant 0 : i32
    return %c0_i32, %c0_i32_0 : i32, i32
  }
  func.func @transform_5(%arg0: i32) -> (i32, i32) {
    %c0_i32 = arith.constant 0 : i32
    %c0_i32_0 = arith.constant 0 : i32
    %c0_i32_1 = arith.constant 0 : i32
    return %c0_i32, %c0_i32_0 : i32, i32
  }
  func.func @transform_6(%arg0: i32) -> (i32, i32) {
    %c0_i32 = arith.constant 0 : i32
    %c0_i32_0 = arith.constant 0 : i32
    %c0_i32_1 = arith.constant 0 : i32
    return %c0_i32, %c0_i32_0 : i32, i32
  }
  func.func @transform_7(%arg0: i32) -> (i32, i32) {
    %c0_i32 = arith.constant 0 : i32
    %c0_i32_0 = arith.constant 0 : i32
    return %c0_i32, %arg0 : i32, i32
  }
}

</mosaic_0001>

<bundles_post_ra>
// kernel: rawnet_forward.1
= control target key start
LH: loop header
LB: loop body
LE: loop exit
PB: predicated region body
PF: predicated region fallthrough
CT: control target
= control target key end

     0   :  { %s1152_s0 = inlined_call_operand.vmem [shape: f32[2,1000], index: 0, kind: input, shape index: {}]   ;;  %s1153_s1 = inlined_call_operand.vmem [shape: f32[32,2], index: 1, kind: input, shape index: {}]   ;;  %s1154_s2 = inlined_call_operand.vmem [shape: f32[64,32], index: 2, kind: input, shape index: {}]   ;;  %s1155_s3 = inlined_call_operand.vmem [shape: f32[1,64], index: 3, kind: input, shape index: {}]   ;;  %s1156_s4 = inlined_call_operand.vmem [shape: f32[32,1], index: 4, kind: input, shape index: {}]   ;;  %s1157_s5 = inlined_call_operand.vmem [shape: f32[64,1], index: 5, kind: input, shape index: {}]   ;;  %s1158_s6 = inlined_call_operand.<no memory space> [shape: f32[1,1], index: 6, kind: input, shape index: {}]   ;;  %s1159_s7 = inlined_call_operand.hbm [shape: f32[1,1000], index: 7, kind: output, shape index: {}]  }
   0x1   :  { %v12_v0 = vstv %s1158_s6 }
   0x2   :  { %13 = vst [vmem:[#allocation2] sm:$0x1] %v12_v0 }
   0x3   :  { %14 = vsyncpa [#allocation4], 0 }
   0x4   :  { %16 = vsyncpa [#allocation4 + $0x1], 0  ;;  %s973_s26 = smov 0   ;;  %s975_s27 = smov 0  }
   0x5   :  { %s977_s28 = smov 0   ;;  %s979_s29 = smov 0  }
   0x6 LB: > { %s724_s6 = sadd.s32 4294967295, %s926_s29   ;;  %s725_s30 = sadd.s32 4294967294, %s926_s29   ;;  %s926_s29 = sphi %s979_s29, %s1165_s29   ;;  %s922_s28 = sphi %s977_s28, %s1164_s28   ;;  %s918_s27 = sphi %s975_s27, %s1163_s27   ;;  %s914_s26 = sphi %s973_s26, %s1162_s26  }
   0x7   : > { %s996_s8 = sadd.s32 1, %s926_s29   ;;  %s181_s9 = sadd.s32 1, %s922_s28 }
   0x8   : > { %s178_s10 = ssub.s32 %s926_s29, %s996_s8  ;;  %p191_p0 = scmp.ne.s32.totalorder %s922_s28, %s918_s27 }
   0x9   : > { %p179_p1 = scmp.eq.s32.totalorder %s178_s10, 0  ;;  %p192_p2 = scmp.eq.s32.totalorder %s724_s6, 3 }
   0xa   : > { %p197_p3 = scmp.ne.s32.totalorder %s918_s27, %s914_s26  ;;  %p198_p4 = scmp.eq.s32.totalorder %s725_s30, 3 }
   0xb   : > { %s1008_s11 = scalar_select %p179_p1, %s922_s28, %s181_s9  }
   0xc   : > { %p1010_p5 = por %p192_p2, %p191_p0  ;;  %p1014_p6 = por %p198_p4, %p197_p3 }
   0xd   : > { %p728_p7 = scmp.ge.s32.totalorder %s926_s29, 1  ;;  %p243_p8 = scmp.lt.s32.totalorder %s926_s29, 5 }
   0xf   : > { %p244_p9 = pnand %p728_p7, %p243_p8 }
  0x10   : > { %s1070_s16 = sshll.u32 (!%p244_p9), %s724_s6, 1  ;;  %s272_s24 = sand.u32 (!%p244_p9), 1, %s918_s27  }
  0x11   : > { %247 = sbr.rel (%p244_p9) target bundleno = 511 (0x1ff), region = 48  ;;  %p276_p10 = scmp.lt.s32.totalorder (!%p244_p9), %s1070_s16, 7 }
  0x12   : > { %s729_s25 = sshll.u32 (!%p244_p9), %s272_s24, 1  ;;  %s661_s10 = scalar_lea.hbm (!%p244_p9), %s1159_s7, %s1070_s16 }
  0x13   : > { %s274_s14 = scalar_lea.vmem (!%p244_p9), [#allocation3], %s729_s25  ;;  %s884_s6 = scalar_lea.hbm (!%p244_p9), %s1159_s7, 8 }
  0x14   : > { %s663_s15 = sshll.u32 (!%p244_p9), %s274_s14, 4  ;;  %s664_s15 = int_to_ptr.vmem [resolvable:$true] %s663_s15 }
  0x16   : > { %v286_v1 = vld [vmem:[%s1153_s1 + $0x18] sm:$0xff]  ;;  %v285_v2 = vld [vmem:[%s1153_s1 + $0x10] sm:$0xff]  ;;  %v284_v3 = vld [vmem:[%s1153_s1 + $0x8] sm:$0xff]  ;;  %v928_v4 = vmov 0   ;;  %v929_v5 = vmov 1   ;;  %s277_s17 = scalar_select %p276_p10, %s1070_s16, 7 }
  0x17   : > { %807 = vset.pattern.permute.xlu2 %v928_v4  ;;  %805 = vset.pattern.permute.xlu1 %v928_v4  ;;  %v283_v6 = vld [vmem:[%s1153_s1] sm:$0xff]  ;;  %v363_v7 = vld [vmem:[%s1156_s4 + $0x18] sm:$0xff]  ;;  %v362_v8 = vld [vmem:[%s1156_s4 + $0x10] sm:$0xff]  ;;  %vm456_vm0 = vcmask 261120   ;;  %vm587_vm1 = vcmask 523264   ;;  %vm642_vm2 = vcmask 1040384  }
  0x18   : > { %803 = vset.pattern.permute.xlu0 %v928_v4  ;;  %299 = vperm.xlu1 %805, %v285_v2   ;;  %v360_v9 = vld [vmem:[%s1156_s4] sm:$0xff]  ;;  %v361_v10 = vld [vmem:[%s1156_s4 + $0x8] sm:$0xff]  ;;  %v415_v11 = vld [vmem:[%s1157_s5 + $0x38] sm:$0xff]  ;;  %s731_s18 = sshll.u32 %s277_s17, 1  ;;  %s665_s17 = sshll.u32 %s661_s10, 4  ;;  %s666_s17 = int_to_ptr.hbm [resolvable:$true] %s665_s17 }
  0x19   : > { %304 = vperm.xlu0 %803, %v286_v1   ;;  %294 = vperm.xlu2 %807, %v284_v3   ;;  %v411_v12 = vld [vmem:[%s1157_s5 + $0x18] sm:$0xff]  ;;  %v414_v13 = vld [vmem:[%s1157_s5 + $0x30] sm:$0xff]  ;;  %v413_v14 = vld [vmem:[%s1157_s5 + $0x28] sm:$0xff]  ;;  %s279_s21 = scalar_lea.vmem %s1152_s0, %s731_s18  ;;  %s651_s18 = scalar_lea.sflag [#allocation4], %s272_s24 }
  0x1a   : > { %v408_v15 = vld [vmem:[%s1157_s5] sm:$0xff]  ;;  %v410_v17 = vld [vmem:[%s1157_s5 + $0x10] sm:$0xff]  ;;  %v409_v18 = vld [vmem:[%s1157_s5 + $0x8] sm:$0xff]  ;;  %s878_s19 = sshra.s32 %s666_s17, 4  ;;  %s879_s19 = int_to_ptr.hbm [resolvable:$true] %s878_s19 }
  0x1b   : > { %v412_v16 = vld [vmem:[%s1157_s5 + $0x20] sm:$0xff]  ;;  %s880_s16 = scalar_lea.hbm %s879_s19, 2  ;;  %p885_p0 = scmp.lt.s32.totalorder %s879_s19, %s1159_s7 }
  0x1c   : > { %v580_v19 = vld [vmem:[#allocation2] sm:$0x1]  ;;  %p881_p11 = scmp.ne.s32.totalorder %s879_s19, %s880_s16  ;;  %p886_p1 = scmp.lt.s32.totalorder %s884_s6, %s880_s16 }
  0x1d   : > { %v282_v24 = vld [vmem:[%s279_s21] sm:$0xf] }
  0x1e   : > { %v338_v25 = vperm.slane %v282_v24, 1  ;;  %v339_v26 = vperm.slane %v282_v24, 3  ;;  %v308_v27 = vperm.slane %v282_v24, 0  ;;  %v309_v28 = vperm.slane %v282_v24, 2  ;;  %v404_v24 = vld [vmem:[%s1154_s2 + $0x20] sm:$0xff]  ;;  %p882_p12 = pnand %p881_p11, %p1010_p5  ;;  %p887_p2 = por %p886_p1, %p885_p0 }
  0x20   : > { %806 = vset.pattern.permute.xlu1 %v929_v5  ;;  %v342_v31 = vperm.slane %v338_v25, 1  ;;  %v343_v32 = vperm.slane %v339_v26, 1  ;;  %v312_v33 = vperm.slane %v308_v27, 0  ;;  %v313_v34 = vperm.slane %v309_v28, 0  ;;  %p883_p13 = pneg %p882_p12 }
  0x21   : > { %804 = vset.pattern.permute.xlu0 %v929_v5  ;;  %808 = vset.pattern.permute.xlu2 %v929_v5 }
  0x22   : > { %335 = vperm.xlu0 %804, %v286_v1   ;;  %331 = vperm.xlu1 %806, %v285_v2   ;;  %p888_p3 = pnand %p887_p2, %p883_p13 }
  0x23   : > { %327 = vperm.xlu2 %808, %v284_v3  }
  0x2a   : > { %809 = vset.pattern.permute.xlu1 %v928_v4  ;;  %323 = vperm.xlu0 %804, %v283_v6  }
  0x2b   : > { %810 = vset.pattern.permute.xlu2 %v928_v4  ;;  %381 = vperm.xlu1 %809, %v363_v7  }
  0x2c   : > { %289 = vperm.xlu2 %810, %v283_v6  }
  0x32   : > { %811 = vset.pattern.permute.xlu0 %v928_v4 }
  0x33   : > { %376 = vperm.xlu1 %809, %v362_v8   ;;  %366 = vperm.xlu0 %811, %v360_v9  }
  0x34   : > { %371 = vperm.xlu2 %810, %v361_v10  }
  0x3b   : > { %453 = vperm.xlu1 %809, %v415_v11   ;;  %433 = vperm.xlu0 %811, %v411_v12  }
  0x3c   : > { %448 = vperm.xlu2 %810, %v414_v13  }
  0x43   : > { %443 = vperm.xlu1 %809, %v413_v14   ;;  %418 = vperm.xlu0 %811, %v408_v15  }
  0x44   : > { %438 = vperm.xlu2 %810, %v412_v16   ;;  %v400_v16 = vld [vmem:[%s1154_s2] sm:$0xff] }
  0x4b   : > { %428 = vperm.xlu1 %809, %v410_v17   ;;  %v405_v17 = vld [vmem:[%s1154_s2 + $0x28] sm:$0xff] }
  0x4c   : > { %423 = vperm.xlu2 %810, %v409_v18  }
  0x53   : > { %583 = vperm.xlu1 %809, %v580_v19   ;;  %v401_v19 = vld [vmem:[%s1154_s2 + $0x8] sm:$0xff] }
  0x73   : > { %v295_v20 = vpop.permute.xlu2 %294 }
  0x74   : > { %v316_v43 = vmul.f32 %v312_v33, %v295_v20  ;;  %v317_v48 = vmul.f32 %v313_v34, %v295_v20  ;;  %v406_v20 = vld [vmem:[%s1154_s2 + $0x30] sm:$0xff] }
  0x7d   : > { %v328_v23 = vpop.permute.xlu2 %327 }
  0x7e   : > { %v346_v44 = vmul.f32 %v342_v31, %v328_v23  ;;  %v347_v49 = vmul.f32 %v343_v32, %v328_v23  ;;  %v403_v23 = vld [vmem:[%s1154_s2 + $0x18] sm:$0xff] }
  0x80   : > { %v354_v52 = vadd.f32 %v346_v44, %v316_v43  ;;  %v355_v58 = vadd.f32 %v347_v49, %v317_v48 }
  0x86   : > { %v290_v37 = vpop.permute.xlu2 %289 }
  0x87   : > { %v314_v53 = vmul.f32 %v312_v33, %v290_v37  ;;  %v315_v57 = vmul.f32 %v313_v34, %v290_v37 }
  0x8a   : > { %v300_v21 = vpop.permute.xlu1 %299 }
  0x8b   : > { %v305_v22 = vpop.permute.xlu0 %304  ;;  %v318_v54 = vmul.f32 %v312_v33, %v300_v21  ;;  %v319_v55 = vmul.f32 %v313_v34, %v300_v21  ;;  %v402_v21 = vld [vmem:[%s1154_s2 + $0x10] sm:$0xff] }
  0x8c   : > { %v320_v38 = vmul.f32 %v312_v33, %v305_v22  ;;  %v321_v39 = vmul.f32 %v313_v34, %v305_v22  ;;  %v407_v22 = vld [vmem:[%s1154_s2 + $0x38] sm:$0xff] }
  0x8e   : > { %v372_v60 = vpop.permute.xlu2 %371 }
  0x8f   : > { %v386_v2 = vadd.f32 %v372_v60, %v354_v52  ;;  %v387_v7 = vadd.f32 %v372_v60, %v355_v58 }
  0x94   : > { %v336_v29 = vpop.permute.xlu0 %335  ;;  %v332_v30 = vpop.permute.xlu1 %331 }
  0x95   : > { %v350_v35 = vmul.f32 %v342_v31, %v336_v29  ;;  %v351_v36 = vmul.f32 %v343_v32, %v336_v29  ;;  %v348_v50 = vmul.f32 %v342_v31, %v332_v30  ;;  %v349_v51 = vmul.f32 %v343_v32, %v332_v30 }
  0x96   : > { %v449_v34 = vpop.permute.xlu2 %448 }
  0x97   : > { %v358_v41 = vadd.f32 %v350_v35, %v320_v38  ;;  %v359_v42 = vadd.f32 %v351_v36, %v321_v39  ;;  %v356_v61 = vadd.f32 %v348_v50, %v318_v54  ;;  %v357_v62 = vadd.f32 %v349_v51, %v319_v55 }
  0x9c   : > { %v324_v40 = vpop.permute.xlu0 %323 }
  0x9d   : > { %v382_v45 = vpop.permute.xlu1 %381  ;;  %v344_v56 = vmul.f32 %v342_v31, %v324_v40  ;;  %v345_v59 = vmul.f32 %v343_v32, %v324_v40 }
  0x9e   : > { %v390_v46 = vadd.f32 %v382_v45, %v358_v41  ;;  %v391_v47 = vadd.f32 %v382_v45, %v359_v42 }
  0x9f   : > { %v352_v5 = vadd.f32 %v344_v56, %v314_v53  ;;  %v353_v8 = vadd.f32 %v345_v59, %v315_v57 }
  0xa0   : > { %812 = vtanh.f32 %v390_v46 }
  0xa1   : > { %814 = vtanh.f32 %v391_v47  ;;  %v439_v47 = vpop.permute.xlu2 %438 }
  0xa5   : > { %v377_v63 = vpop.permute.xlu1 %376  ;;  %v367_v0 = vpop.permute.xlu0 %366 }
  0xa6   : > { %v813_v1 = vpop.eup %812  ;;  %v388_v3 = vadd.f32 %v377_v63, %v356_v61  ;;  %v389_v4 = vadd.f32 %v377_v63, %v357_v62  ;;  %v384_v9 = vadd.f32 %v367_v0, %v352_v5  ;;  %v385_v10 = vadd.f32 %v367_v0, %v353_v8 }
  0xa7   : > { %v815_v6 = vpop.eup %814  ;;  %493 = vmatpush.msra.mxu0 %v813_v1  ;;  %754 = vmatpush.msra.mxu2 %v813_v1 }
  0xa8   : > { %816 = vtanh.f32 %v388_v3  ;;  %534 = vmatpush.msra.mxu1 %v815_v6  ;;  %758 = vmatpush.msra.mxu3 %v815_v6 }
  0xa9   : > { %818 = vtanh.f32 %v389_v4  ;;  %v424_v0 = vpop.permute.xlu2 %423 }
  0xaa   : > { %820 = vtanh.f32 %v386_v2 }
  0xab   : > { %822 = vtanh.f32 %v387_v7 }
  0xac   : > { %824 = vtanh.f32 %v384_v9 }
  0xad   : > { %826 = vtanh.f32 %v385_v10  ;;  %v454_v31 = vpop.permute.xlu1 %453  ;;  %v434_v49 = vpop.permute.xlu0 %433 }
  0xae   : > { %v817_v11 = vpop.eup %816 }
  0xaf   : > { %v819_v12 = vpop.eup %818  ;;  %494 = vmatpush.msra.mxu0 %v817_v11  ;;  %755 = vmatpush.msra.mxu2 %v817_v11 }
  0xb0   : > { %v821_v13 = vpop.eup %820  ;;  %535 = vmatpush.msra.mxu1 %v819_v12  ;;  %759 = vmatpush.msra.mxu3 %v819_v12 }
  0xb1   : > { %v823_v14 = vpop.eup %822  ;;  %495 = vmatpush.msra.mxu0 %v821_v13  ;;  %756 = vmatpush.msra.mxu2 %v821_v13 }
  0xb2   : > { %v825_v15 = vpop.eup %824  ;;  %536 = vmatpush.msra.mxu1 %v823_v14  ;;  %760 = vmatpush.msra.mxu3 %v823_v14 }
  0xb3   : > { %v827_v18 = vpop.eup %826  ;;  %496 = vmatpush.msra.mxu0 %v825_v15  ;;  %757 = vmatpush.msra.mxu2 %v825_v15  ;;  %v579_v15 = vld [vmem:[%s1155_s3] sm:$0x1] }
  0xb4   : > { %537 = vmatpush.msra.mxu1 %v827_v18  ;;  %761 = vmatpush.msra.mxu3 %v827_v18 }
  0xb5   : > { %732 = vmatmul.msk.f32.vlgmr.msra.gmra.mxu0 %vm456_vm0, %v400_v16  ;;  %737 = vmatmul.msk.f32.vlgmr.msra.gmra.mxu2 %vm456_vm0, %v405_v17  ;;  %v444_v41 = vpop.permute.xlu1 %443  ;;  %v419_v3 = vpop.permute.xlu0 %418 }
  0xb6   : > { %740 = vmatmul.msk.f32.vlgmr.msra.gmra.mxu1 %vm456_vm0, %v400_v16  ;;  %745 = vmatmul.msk.f32.vlgmr.msra.gmra.mxu3 %vm456_vm0, %v405_v17 }
  0xbd   : > { %733 = vmatmul.msk.f32.gmra.mxu0 %vm456_vm0, %v401_v19  ;;  %738 = vmatmul.msk.f32.gmra.mxu2 %vm456_vm0, %v406_v20  ;;  %v429_v58 = vpop.permute.xlu1 %428 }
  0xbe   : > { %741 = vmatmul.msk.f32.gmra.mxu1 %vm456_vm0, %v401_v19  ;;  %746 = vmatmul.msk.f32.gmra.mxu3 %vm456_vm0, %v406_v20 }
  0xc5   : > { %734 = vmatmul.msk.f32.gmra.mxu0 %vm456_vm0, %v402_v21  ;;  %739 = vmatmul.msk.f32.gmra.mxu2 %vm456_vm0, %v407_v22  ;;  %v584_v18 = vpop.permute.xlu1 %583 }
  0xc6   : > { %742 = vmatmul.msk.f32.gmra.mxu1 %vm456_vm0, %v402_v21  ;;  %747 = vmatmul.msk.f32.gmra.mxu3 %vm456_vm0, %v407_v22  ;;  %v586_v19 = vperm.slane %v584_v18, 0 }
  0xcd   : > { %735 = vmatmul.msk.f32.gmra.mxu0 %vm456_vm0, %v403_v23 }
  0xce   : > { %743 = vmatmul.msk.f32.gmra.mxu1 %vm456_vm0, %v403_v23 }
  0xd5   : > { %736 = vmatmul.msk.f32.gmra.mxu0 %vm456_vm0, %v404_v24 }
  0xd6   : > { %744 = vmatmul.msk.f32.gmra.mxu1 %vm456_vm0, %v404_v24 }
 0x132   : > { %v498_v25 = vpop.f32.mrf.mxu0 }
 0x133   : > { %v539_v26 = vpop.f32.mrf.mxu1  ;;  %v499_v5 = vadd.f32 %v498_v25, %v419_v3 }
 0x134   : > { %v540_v6 = vadd.f32 %v539_v26, %v419_v3 }
 0x138   : > { %v513_v27 = vpop.f32.mrf.mxu2 }
 0x139   : > { %v554_v28 = vpop.f32.mrf.mxu3  ;;  %v514_v45 = vadd.f32 %v513_v27, %v444_v41 }
 0x13a   : > { %v501_v29 = vpop.f32.mrf.mxu0  ;;  %v555_v48 = vadd.f32 %v554_v28, %v444_v41 }
 0x13b   : > { %v542_v30 = vpop.f32.mrf.mxu1  ;;  %v502_v2 = vadd.f32 %v501_v29, %v424_v0 }
 0x13c   : > { %v543_v4 = vadd.f32 %v542_v30, %v424_v0  ;;  %v645_v30 = vlaneseq }
 0x13e   : > { %vm647_vm3 = vcmp.lt.s32.totalorder %v645_v30, 256 }
 0x140   : > { %v516_v32 = vpop.f32.mrf.mxu2 }
 0x141   : > { %v557_v33 = vpop.f32.mrf.mxu3  ;;  %v517_v38 = vadd.f32 %v516_v32, %v449_v34 }
 0x142   : > { %v504_v35 = vpop.f32.mrf.mxu0  ;;  %v558_v42 = vadd.f32 %v557_v33, %v449_v34 }
 0x143   : > { %v545_v36 = vpop.f32.mrf.mxu1  ;;  %v505_v62 = vadd.f32 %v504_v35, %v429_v58 }
 0x144   : > { %v546_v1 = vadd.f32 %v545_v36, %v429_v58 }
 0x148   : > { %v519_v37 = vpop.f32.mrf.mxu2 }
 0x149   : > { %v520_v39 = vadd.f32 %v519_v37, %v454_v31  ;;  %v560_v40 = vpop.f32.mrf.mxu3 }
 0x14a   : > { %v561_v43 = vadd.f32 %v560_v40, %v454_v31  ;;  %v507_v44 = vpop.f32.mrf.mxu0 }
 0x14b   : > { %828 = vtanh.f32 %v520_v39  ;;  %v548_v46 = vpop.f32.mrf.mxu1  ;;  %v508_v54 = vadd.f32 %v507_v44, %v434_v49 }
 0x14c   : > { %830 = vtanh.f32 %v561_v43  ;;  %v549_v59 = vadd.f32 %v548_v46, %v434_v49 }
 0x14d   : > { %832 = vtanh.f32 %v517_v38 }
 0x14e   : > { %834 = vtanh.f32 %v558_v42 }
 0x14f   : > { %836 = vtanh.f32 %v514_v45 }
 0x150   : > { %838 = vtanh.f32 %v555_v48 }
 0x151   : > { %v829_v50 = vpop.eup %828 }
 0x152   : > { %v831_v51 = vpop.eup %830  ;;  %v510_v52 = vpop.f32.mrf.mxu0  ;;  %599 = vmatpush.msrb.mxu2 %v829_v50 }
 0x153   : > { %v833_v53 = vpop.eup %832  ;;  %v511_v55 = vadd.f32 %v510_v52, %v439_v47  ;;  %v551_v56 = vpop.f32.mrf.mxu1  ;;  %619 = vmatpush.msrb.mxu3 %v831_v51 }
 0x154   : > { %v835_v57 = vpop.eup %834  ;;  %v552_v60 = vadd.f32 %v551_v56, %v439_v47  ;;  %600 = vmatpush.msrb.mxu2 %v833_v53 }
 0x155   : > { %v837_v61 = vpop.eup %836  ;;  %840 = vtanh.f32 %v511_v55  ;;  %620 = vmatpush.msrb.mxu3 %v835_v57 }
 0x156   : > { %v839_v63 = vpop.eup %838  ;;  %842 = vtanh.f32 %v552_v60  ;;  %601 = vmatpush.msrb.mxu2 %v837_v61 }
 0x157   : > { %844 = vtanh.f32 %v508_v54  ;;  %621 = vmatpush.msrb.mxu3 %v839_v63 }
 0x158   : > { %846 = vtanh.f32 %v549_v59 }
 0x159   : > { %848 = vtanh.f32 %v505_v62 }
 0x15a   : > { %850 = vtanh.f32 %v546_v1 }
 0x15b   : > { %v841_v7 = vpop.eup %840  ;;  %852 = vtanh.f32 %v502_v2 }
 0x15c   : > { %v843_v8 = vpop.eup %842  ;;  %854 = vtanh.f32 %v543_v4  ;;  %602 = vmatpush.msrb.mxu2 %v841_v7 }
 0x15d   : > { %v845_v9 = vpop.eup %844  ;;  %856 = vtanh.f32 %v499_v5  ;;  %622 = vmatpush.msrb.mxu3 %v843_v8 }
 0x15e   : > { %v847_v10 = vpop.eup %846  ;;  %858 = vtanh.f32 %v540_v6  ;;  %603 = vmatpush.msrb.mxu2 %v845_v9 }
 0x15f   : > { %v849_v11 = vpop.eup %848  ;;  %623 = vmatpush.msrb.mxu3 %v847_v10 }
 0x160   : > { %v851_v12 = vpop.eup %850  ;;  %604 = vmatpush.msrb.mxu2 %v849_v11 }
 0x161   : > { %v853_v13 = vpop.eup %852  ;;  %624 = vmatpush.msrb.mxu3 %v851_v12 }
 0x162   : > { %v855_v14 = vpop.eup %854  ;;  %605 = vmatpush.msrb.mxu2 %v853_v13 }
 0x163   : > { %v857_v16 = vpop.eup %856  ;;  %625 = vmatpush.msrb.mxu3 %v855_v14 }
 0x164   : > { %v859_v17 = vpop.eup %858  ;;  %606 = vmatpush.msrb.mxu2 %v857_v16 }
 0x165   : > { %626 = vmatpush.msrb.mxu3 %v859_v17  ;;  %748 = vmatmul.msk.f32.vlgmr.msrb.gmra.mxu2 %vm587_vm1, %v579_v15 }
 0x166   : > { %749 = vmatmul.msk.f32.vlgmr.msrb.gmra.mxu3 %vm587_vm1, %v579_v15 }
 0x1e8   : > { %v608_v20 = vpop.f32.mrf.mxu2 }
 0x1e9   : > { %v609_v21 = vadd.f32 %v608_v20, %v586_v19  ;;  %v628_v22 = vpop.f32.mrf.mxu3 }
 0x1ea   : > { %v629_v23 = vadd.f32 %v628_v22, %v586_v19 }
 0x1eb   : > { %v631_v24 = vmul.f32 0.5, %v609_v21 }
 0x1ec   : > { %v632_v25 = vmul.f32 0.5, %v629_v23 }
 0x1ed   : > { %860 = vtanh.f32 %v631_v24 }
 0x1ee   : > { %862 = vtanh.f32 %v632_v25 }
 0x1f3   : > { %v861_v26 = vpop.eup %860 }
 0x1f4   : > { %v863_v27 = vpop.eup %862  ;;  %v635_v28 = vadd.f32 1.0, %v861_v26 }
 0x1f5   : > { %v636_v29 = vadd.f32 1.0, %v863_v27 }
 0x1f6   : > { %v637_v32 = vmul.f32 0.5, %v635_v28 }
 0x1f7   : > { %v638_v31 = vmul.f32 0.5, %v636_v29 }
 0x1f9   : > { %v641_v33 = vrot.slane %v638_v31, 7 }
 0x1fb   : > { %v643_v34 = vsel %vm642_vm2, %v637_v32, %v641_v33 }
 0x1fc   : > { %649 = vst.msk [vmem:[%s274_s14] sm:$0x3] %vm647_vm3, %v643_v34 }
 0x1fd   : > { %891 = shalt.err (!%p888_p3)
}
 0x1fe   : > { %762 = dma.vmem_to_hbm [thread:$0]  (%p1010_p5), %s664_s15, 32, %s666_s17, %s651_s18  }
 0x1ff PF: > { %p768_p4 = scmp.ge.s32.totalorder %s926_s29, 2  ;;  %s677_s24 = sand.u32 1, %s914_s26  }
 0x200   : > { %s678_s25 = scalar_lea.sflag [#allocation4], %s677_s24 }
 0x201   : > { %p765_p7 = pnand %p768_p4, %p1014_p6 }
 0x203   : > { %p766_p8 = pneg %p765_p7 }
 0x205   : > { %909 = dma.done.wait (%p766_p8), %s678_s25, 32  }
 0x206   : > { %911 = vsyncadd (%p766_p8), %s678_s25, 4294967264  ;;  %p19_p9 = scmp.ge.s32.totalorder %s996_s8, 6   ;;  %s1162_s26 = smov %s918_s27 }
 0x207   : > { %s1163_s27 = smov %s922_s28  ;;  %s1164_s28 = smov %s1008_s11 }
 0x208   : > { %s1165_s29 = smov %s996_s8  ;;  %21 = sbr.rel (!%p19_p9) target bundleno = 6 (0x6), region = 83 }
 0x20d   :  { %684 = vsyncpa [#allocation4], 1 }
 0x20e   :  { %686 = vsyncpa [#allocation4 + $0x1], 1 }

</bundles_post_ra>
